<compile_context>
chip_gen: v6e
topology: v6e:2x2x1
jax: 0.10.0
libtpu: 0.0.40
codegen_flags: <defaults>
</compile_context>

<pallas_src>
import functools

import jax
import jax.numpy as jnp
from jax.experimental import pallas as pl
from jax.experimental.pallas import tpu as pltpu


def _round_up(x, m):
    return (x + m - 1) // m * m


def fnn_kernel(x_ref, w1_ref, b1_ref, w2_ref, b2_ref, o_ref):
    # x_ref: (TB, 784) bf16, w1_ref: (784, HP) bf16, b1_ref: (1, HP) f32
    # w2_ref: (HP, CP) bf16,  b2_ref: (1, CP)  f32,  o_ref:  (TB, CP) f32
    h = jnp.dot(x_ref[...], w1_ref[...], preferred_element_type=jnp.float32)
    h = jnp.maximum(h + b1_ref[...], 0.0)            # f32 bias + ReLU epilogue
    out = jnp.dot(h.astype(jnp.bfloat16), w2_ref[...],
                  preferred_element_type=jnp.float32)
    o_ref[...] = out + b2_ref[...]


def prepare_params(w1, b1, w2, b2):
    """One-time prep: cast weights to bf16 and zero-pad to lane-aligned shapes.

    Weights are stored as (in, out), i.e. already torch-weight.T, so the
    kernel computes relu(x @ W1 + b1) @ W2 + b2 == the nn.Linear forward.
    Biases stay f32 (added to the f32 MXU accumulator inside the kernel).
    """
    K, H = w1.shape                      # 784, 500
    C = w2.shape[1]                      # num_classes
    HP = _round_up(H, 128)               # 512  (lane-dense hidden)
    CP = _round_up(max(C, 128), 128)     # >=128 (lane-dense output store)

    w1p = jnp.zeros((K, HP), jnp.bfloat16).at[:, :H].set(w1.astype(jnp.bfloat16))
    b1p = jnp.zeros((1, HP), jnp.float32).at[0, :H].set(b1)
    w2p = jnp.zeros((HP, CP), jnp.bfloat16).at[:H, :C].set(w2.astype(jnp.bfloat16))
    b2p = jnp.zeros((1, CP), jnp.float32).at[0, :C].set(b2)
    return (w1p, b1p, w2p, b2p), C


@functools.partial(jax.jit, static_argnames=("num_classes",))
def fnn_forward(x_nchw, w1p, b1p, w2p, b2p, *, num_classes):
    """x_nchw: (B, 1, 28, 28) f32; padded bf16 params from prepare_params.

    Returns logits (B, num_classes) f32.
    """
    B = x_nchw.shape[0]
    K, HP = w1p.shape                    # 784, 512
    CP = w2p.shape[1]                    # >=128

    TB = min(128, _round_up(B, 8))       # batch tile, multiple of 8
    BP = _round_up(B, TB)                # padded batch (tail handled by pad)

    xp = jnp.zeros((BP, K), jnp.bfloat16).at[:B].set(
        x_nchw.reshape(B, -1).astype(jnp.bfloat16))

    flops = 2 * BP * K * HP + 2 * BP * HP * CP
    bytes_accessed = (xp.size * 2 + w1p.size * 2 + w2p.size * 2
                      + b1p.size * 4 + b2p.size * 4 + BP * CP * 4)

    out = pl.pallas_call(
        fnn_kernel,
        out_shape=jax.ShapeDtypeStruct((BP, CP), jnp.float32),
        grid_spec=pl.GridSpec(
            grid=(BP // TB,),
            in_specs=[
                pl.BlockSpec((TB, K), lambda i: (i, 0)),   # batch-tiled input
                pl.BlockSpec((K, HP), lambda i: (0, 0)),   # weights VMEM-resident
                pl.BlockSpec((1, HP), lambda i: (0, 0)),
                pl.BlockSpec((HP, CP), lambda i: (0, 0)),
                pl.BlockSpec((1, CP), lambda i: (0, 0)),
            ],
            out_specs=pl.BlockSpec((TB, CP), lambda i: (i, 0)),
        ),
        compiler_params=pltpu.CompilerParams(
            dimension_semantics=("parallel",)),            # megacore on v7x
        cost_estimate=pl.CostEstimate(
            flops=flops, transcendentals=0, bytes_accessed=bytes_accessed),
    )(xp, w1p, b1p, w2p, b2p)

    return out[:B, :num_classes]


def init_params(key, num_classes):
    """Deterministic init mimicking nn.Linear's uniform(-1/sqrt(fan_in), +)."""
    k1, k2, k3, k4 = jax.random.split(key, 4)
    in1, out1 = 784, 500
    in2, out2 = 500, num_classes
    bound1 = 1.0 / jnp.sqrt(in1)
    bound2 = 1.0 / jnp.sqrt(in2)
    # stored as (in, out); equals torch weight.T -> same math as nn.Linear
    w1 = jax.random.uniform(k1, (in1, out1), jnp.float32, -bound1, bound1)
    b1 = jax.random.uniform(k2, (out1,), jnp.float32, -bound1, bound1)
    w2 = jax.random.uniform(k3, (in2, out2), jnp.float32, -bound2, bound2)
    b2 = jax.random.uniform(k4, (out2,), jnp.float32, -bound2, bound2)
    return w1, b1, w2, b2


if __name__ == "__main__":
    num_classes = 10
    key = jax.random.PRNGKey(0)
    kx, kp = jax.random.split(key)

    # MNIST-like input: batch=2, NCHW (2, 1, 28, 28) -> flattened to 784.
    x = jax.random.normal(kx, (2, 1, 28, 28), jnp.float32)
    w1, b1, w2, b2 = init_params(kp, num_classes)

    (w1p, b1p, w2p, b2p), C = prepare_params(w1, b1, w2, b2)   # one-time prep
    logits = fnn_forward(x, w1p, b1p, w2p, b2p, num_classes=C)
    jax.block_until_ready(logits)

    # Sanity check vs plain-JAX f32 reference (bf16 weights -> loose tol).
    xf = x.reshape(x.shape[0], -1)
    ref = jnp.maximum(xf @ w1 + b1, 0.0) @ w2 + b2
    assert logits.shape == (2, num_classes)
    assert jnp.allclose(logits, ref, atol=2e-2, rtol=2e-2), (
        float(jnp.max(jnp.abs(logits - ref))))

    # TODO(synk): FNN.get_loss (CE / MSE vs one-hot) is training-time loss,
    # not part of forward(); intentionally not implemented as a kernel.
    print("KERNEL_OK")
</pallas_src>

<mosaic_0001>
module attributes {stable_mosaic.version = 11 : i64} {
  func.func @fnn_kernel(%arg0: i32, %arg1: memref<8x784xbf16, #tpu.memory_space<vmem>>, %arg2: memref<784x512xbf16, #tpu.memory_space<vmem>>, %arg3: memref<1x512xf32, #tpu.memory_space<vmem>>, %arg4: memref<512x128xbf16, #tpu.memory_space<vmem>>, %arg5: memref<1x128xf32, #tpu.memory_space<vmem>>, %arg6: memref<8x128xf32, #tpu.memory_space<vmem>>) attributes {dimension_semantics = [#tpu.dimension_semantics<parallel>], iteration_bounds = array<i64: 1>, scalar_prefetch = 0 : i64, scratch_operands = 0 : i64, tpu.core_type = #tpu.core_type<tc>, window_params = [{transform_indices = @transform_0, window_bounds = array<i64: 8, 784>}, {pipeline_mode = #tpu.pipeline_mode<synchronous>, transform_indices = @transform_1, window_bounds = array<i64: 784, 512>}, {pipeline_mode = #tpu.pipeline_mode<synchronous>, transform_indices = @transform_2, window_bounds = array<i64: 1, 512>}, {pipeline_mode = #tpu.pipeline_mode<synchronous>, transform_indices = @transform_3, window_bounds = array<i64: 512, 128>}, {pipeline_mode = #tpu.pipeline_mode<synchronous>, transform_indices = @transform_4, window_bounds = array<i64: 1, 128>}, {transform_indices = @transform_5, window_bounds = array<i64: 8, 128>}]} {
    %c0 = arith.constant 0 : index
    %c0_0 = arith.constant 0 : index
    %0 = vector.load %arg1[%c0, %c0_0] : memref<8x784xbf16, #tpu.memory_space<vmem>>, vector<8x784xbf16>
    %c0_1 = arith.constant 0 : index
    %c0_2 = arith.constant 0 : index
    %1 = vector.load %arg2[%c0_1, %c0_2] : memref<784x512xbf16, #tpu.memory_space<vmem>>, vector<784x512xbf16>
    %cst = arith.constant dense<0.000000e+00> : vector<8x512xf32>
    %2 = tpu.matmul %0, %1, %cst {dimension_numbers = #tpu.dot_dimension_numbers<[1], [0], [0], [1], [0, 0, 1, 1], [], []>} : vector<8x784xbf16>, vector<784x512xbf16>, vector<8x512xf32> -> vector<8x512xf32>
    %c0_3 = arith.constant 0 : index
    %c0_4 = arith.constant 0 : index
    %3 = vector.load %arg3[%c0_3, %c0_4] : memref<1x512xf32, #tpu.memory_space<vmem>>, vector<1x512xf32>
    %4 = vector.broadcast %3 : vector<1x512xf32> to vector<8x512xf32>
    %5 = arith.addf %2, %4 : vector<8x512xf32>
    %cst_5 = arith.constant 0.000000e+00 : f32
    %6 = vector.broadcast %cst_5 : f32 to vector<8x512xf32>
    %7 = arith.maximumf %5, %6 : vector<8x512xf32>
    %8 = arith.truncf %7 : vector<8x512xf32> to vector<8x512xbf16>
    %c0_6 = arith.constant 0 : index
    %c0_7 = arith.constant 0 : index
    %9 = vector.load %arg4[%c0_6, %c0_7] : memref<512x128xbf16, #tpu.memory_space<vmem>>, vector<512x128xbf16>
    %cst_8 = arith.constant dense<0.000000e+00> : vector<8x128xf32>
    %10 = tpu.matmul %8, %9, %cst_8 {dimension_numbers = #tpu.dot_dimension_numbers<[1], [0], [0], [1], [0, 0, 1, 1], [], []>} : vector<8x512xbf16>, vector<512x128xbf16>, vector<8x128xf32> -> vector<8x128xf32>
    %c0_9 = arith.constant 0 : index
    %c0_10 = arith.constant 0 : index
    %11 = vector.load %arg5[%c0_9, %c0_10] : memref<1x128xf32, #tpu.memory_space<vmem>>, vector<1x128xf32>
    %12 = vector.broadcast %11 : vector<1x128xf32> to vector<8x128xf32>
    %13 = arith.addf %10, %12 : vector<8x128xf32>
    %c0_11 = arith.constant 0 : index
    %c0_12 = arith.constant 0 : index
    %14 = vector.load %arg6[%c0_11, %c0_12] : memref<8x128xf32, #tpu.memory_space<vmem>>, vector<8x128xf32>
    tpu.vector_store %arg6[%c0_11, %c0_12], %13 {strides = array<i32>} : memref<8x128xf32, #tpu.memory_space<vmem>>, vector<8x128xf32>,
    return
  }
  func.func @transform_0(%arg0: i32) -> (i32, i32) {
    %c0_i32 = arith.constant 0 : i32
    %c0_i32_0 = arith.constant 0 : i32
    return %arg0, %c0_i32 : i32, i32
  }
  func.func @transform_1(%arg0: i32) -> (i32, i32) {
    %c0_i32 = arith.constant 0 : i32
    %c0_i32_0 = arith.constant 0 : i32
    %c0_i32_1 = arith.constant 0 : i32
    return %c0_i32, %c0_i32_0 : i32, i32
  }
  func.func @transform_2(%arg0: i32) -> (i32, i32) {
    %c0_i32 = arith.constant 0 : i32
    %c0_i32_0 = arith.constant 0 : i32
    %c0_i32_1 = arith.constant 0 : i32
    return %c0_i32, %c0_i32_0 : i32, i32
  }
  func.func @transform_3(%arg0: i32) -> (i32, i32) {
    %c0_i32 = arith.constant 0 : i32
    %c0_i32_0 = arith.constant 0 : i32
    %c0_i32_1 = arith.constant 0 : i32
    return %c0_i32, %c0_i32_0 : i32, i32
  }
  func.func @transform_4(%arg0: i32) -> (i32, i32) {
    %c0_i32 = arith.constant 0 : i32
    %c0_i32_0 = arith.constant 0 : i32
    %c0_i32_1 = arith.constant 0 : i32
    return %c0_i32, %c0_i32_0 : i32, i32
  }
  func.func @transform_5(%arg0: i32) -> (i32, i32) {
    %c0_i32 = arith.constant 0 : i32
    %c0_i32_0 = arith.constant 0 : i32
    return %arg0, %c0_i32 : i32, i32
  }
}

</mosaic_0001>

<bundles_post_ra>
// kernel: fnn_forward.1
= control target key start
LH: loop header
LB: loop body
LE: loop exit
PB: predicated region body
PF: predicated region fallthrough
CT: control target
= control target key end

     0   :  { %10 = vsyncpa [#allocation3], 0  ;;  %s2733_s0 = inlined_call_operand.vmem [shape: bf16[8,784], index: 0, kind: input, shape index: {}]   ;;  %s2734_s1 = inlined_call_operand.hbm [shape: bf16[784,512], index: 1, kind: input, shape index: {}]   ;;  %s2735_s2 = inlined_call_operand.vmem [shape: f32[1,512], index: 2, kind: input, shape index: {}]   ;;  %s2736_s3 = inlined_call_operand.hbm [shape: bf16[512,128], index: 3, kind: input, shape index: {}]   ;;  %s2737_s4 = inlined_call_operand.vmem [shape: f32[1,128], index: 4, kind: input, shape index: {}]   ;;  %s2738_s5 = inlined_call_operand.vmem [shape: f32[8,128], index: 5, kind: output, shape index: {}]  }
   0x1   :  { %11 = vsyncpa [#allocation5], 0  ;;  %s2631_s18 = smov [#allocation2]  }
   0x2   :  { %s19_s19 = sshll.u32 %s2631_s18, 4  ;;  %s20_s19 = int_to_ptr.vmem [resolvable:$true] %s19_s19 }
   0x3   :  { %s2595_s20 = scalar_lea.vmem %s20_s19, 25088  ;;  %p2600_p1 = scmp.lt.s32.totalorder %s20_s19, %s20_s19 }
   0x4   :  { %p2596_p0 = scmp.ne.s32.totalorder %s20_s19, %s2595_s20  ;;  %p2601_p2 = scmp.lt.s32.totalorder %s2595_s20, %s2595_s20 }
   0x6   :  { %p2602_p3 = por %p2601_p2, %p2600_p1 }
   0x8   :  { %p2603_p4 = pnand %p2602_p3, %p2596_p0 }
   0xa   :  { %2606 = shalt.err (!%p2603_p4)
}
   0xb   :  { %s2632_s21 = smov 256   ;;  %s2633_s22 = smov 16  }
   0xc   :  { %25 = dma.hbm_to_vmem [thread:$0]  %s2734_s1, 25088, %s20_s19, [#allocation3], %s2632_s21, %s2632_s21, %s2633_s22  }
   0xd   :  { %s2634_s25 = smov [#allocation4]  }
   0xe   :  { %s33_s26 = sshll.u32 %s2634_s25, 4  ;;  %s34_s26 = int_to_ptr.vmem [resolvable:$true] %s33_s26 }
   0xf   :  { %s2615_s27 = scalar_lea.vmem %s34_s26, 4096  ;;  %p2620_p6 = scmp.lt.s32.totalorder %s34_s26, %s34_s26 }
  0x10   :  { %p2616_p5 = scmp.ne.s32.totalorder %s34_s26, %s2615_s27  ;;  %p2621_p7 = scmp.lt.s32.totalorder %s2615_s27, %s2615_s27 }
  0x12   :  { %p2622_p8 = por %p2621_p7, %p2620_p6 }
  0x14   :  { %p2623_p9 = pnand %p2622_p8, %p2616_p5 }
  0x16   :  { %2626 = shalt.err (!%p2623_p9)
}
  0x17   :  { %s2635_s28 = smov 64   ;;  %s2636_s29 = smov 4  }
  0x18   :  { %39 = dma.hbm_to_vmem [thread:$0]  %s2736_s3, 4096, %s34_s26, [#allocation5], %s2635_s28, %s2635_s28, %s2636_s29  }
  0x19   :  { %2627 = dma.done.wait [#allocation3], 25088  }
  0x1a   :  { %2628 = vsyncadd [#allocation3], 4294942208 }
  0x1b   :  { %2629 = dma.done.wait [#allocation5], 4096  }
  0x1c   :  { %2630 = vsyncadd [#allocation5], 4294963200  ;;  %v2254_v0 = vld [vmem:[#allocation2 + $0xe4] ss:$16 sps:$4 sm:$0xff]   ;;  %v2258_v2 = vld [vmem:[#allocation2 + $0xe0] ss:$16 sps:$4 sm:$0xff]  }
  0x1d   :  { %v2256_v1 = vld [vmem:[#allocation2 + $0x2e4] ss:$16 sps:$4 sm:$0xff]   ;;  %1279 = vmatprep.subr.bf16.mxu0 %v2254_v0  ;;  %v2259_v3 = vld [vmem:[#allocation2 + $0x2e0] ss:$16 sps:$4 sm:$0xff]   ;;  %v50_v48 = vld [vmem:[%s2733_s0 + $0x8] sm:$0xff]  ;;  %vm1275_vm0 = vcmask 130048  }
  0x1e   :  { %1320 = vmatprep.subr.bf16.mxu1 %v2256_v1  ;;  %v2260_v4 = vld [vmem:[#allocation2 + $0xc4] ss:$16 sps:$4 sm:$0xff]   ;;  %1280 = vmatpush1.bf16.msra.mxu0 %v2258_v2  ;;  %v2264_v6 = vld [vmem:[#allocation2 + $0xc0] ss:$16 sps:$4 sm:$0xff]   ;;  %v2682_v51 = vcombine.high %v50_v48, %v50_v48 }
  0x1f   :  { %1321 = vmatpush1.bf16.msra.mxu1 %v2259_v3  ;;  %v2262_v5 = vld [vmem:[#allocation2 + $0x2c4] ss:$16 sps:$4 sm:$0xff]   ;;  %1281 = vmatprep.subr.bf16.mxu0 %v2260_v4  ;;  %v2265_v7 = vld [vmem:[#allocation2 + $0x2c0] ss:$16 sps:$4 sm:$0xff]  }
  0x20   :  { %1322 = vmatprep.subr.bf16.mxu1 %v2262_v5  ;;  %v2266_v8 = vld [vmem:[#allocation2 + $0xa4] ss:$16 sps:$4 sm:$0xff]   ;;  %v2270_v10 = vld [vmem:[#allocation2 + $0xa0] ss:$16 sps:$4 sm:$0xff]   ;;  %1352 = vmatprep.mubr.bf16.mxu1 %v2682_v51 }
  0x21   :  { %v2268_v9 = vld [vmem:[#allocation2 + $0x2a4] ss:$16 sps:$4 sm:$0xff]   ;;  %v2271_v11 = vld [vmem:[#allocation2 + $0x2a0] ss:$16 sps:$4 sm:$0xff]  }
  0x22   :  { %1282 = vmatpush1.bf16.msra.mxu0 %v2264_v6  ;;  %v2272_v12 = vld [vmem:[#allocation2 + $0x84] ss:$16 sps:$4 sm:$0xff]   ;;  %v2276_v14 = vld [vmem:[#allocation2 + $0x80] ss:$16 sps:$4 sm:$0xff]  }
  0x23   :  { %1323 = vmatpush1.bf16.msra.mxu1 %v2265_v7  ;;  %1283 = vmatprep.subr.bf16.mxu0 %v2266_v8  ;;  %v2274_v13 = vld [vmem:[#allocation2 + $0x284] ss:$16 sps:$4 sm:$0xff]   ;;  %v2277_v15 = vld [vmem:[#allocation2 + $0x280] ss:$16 sps:$4 sm:$0xff]   ;;  %v2688_v7 = vcombine.low %v50_v48, %v50_v48  ;;  %v2414_v48 = vld [vmem:[#allocation2 + $0x1ec] ss:$16 sps:$4 sm:$0xff]  }
  0x24   :  { %1324 = vmatprep.subr.bf16.mxu1 %v2268_v9  ;;  %v2278_v16 = vld [vmem:[#allocation2 + $0x64] ss:$16 sps:$4 sm:$0xff]   ;;  %v2282_v18 = vld [vmem:[#allocation2 + $0x60] ss:$16 sps:$4 sm:$0xff]  }
  0x25   :  { %v2280_v17 = vld [vmem:[#allocation2 + $0x264] ss:$16 sps:$4 sm:$0xff]   ;;  %v2283_v19 = vld [vmem:[#allocation2 + $0x260] ss:$16 sps:$4 sm:$0xff]  }
  0x26   :  { %1284 = vmatpush1.bf16.msra.mxu0 %v2270_v10  ;;  %v2284_v20 = vld [vmem:[#allocation2 + $0x44] ss:$16 sps:$4 sm:$0xff]   ;;  %v2288_v22 = vld [vmem:[#allocation2 + $0x40] ss:$16 sps:$4 sm:$0xff]  }
  0x27   :  { %1325 = vmatpush1.bf16.msra.mxu1 %v2271_v11  ;;  %1285 = vmatprep.subr.bf16.mxu0 %v2272_v12  ;;  %v2286_v21 = vld [vmem:[#allocation2 + $0x244] ss:$16 sps:$4 sm:$0xff]   ;;  %v2289_v23 = vld [vmem:[#allocation2 + $0x240] ss:$16 sps:$4 sm:$0xff]   ;;  %v2365_v11 = vld [vmem:[#allocation2 + $0xec] ss:$16 sps:$4 sm:$0xff]  }
  0x28   :  { %1326 = vmatprep.subr.bf16.mxu1 %v2274_v13  ;;  %v2290_v24 = vld [vmem:[#allocation2 + $0x24] ss:$16 sps:$4 sm:$0xff]   ;;  %v2294_v26 = vld [vmem:[#allocation2 + $0x20] ss:$16 sps:$4 sm:$0xff]   ;;  %v2637_v13 = vmov 0  }
  0x29   :  { %v2292_v25 = vld [vmem:[#allocation2 + $0x224] ss:$16 sps:$4 sm:$0xff]   ;;  %v2295_v27 = vld [vmem:[#allocation2 + $0x220] ss:$16 sps:$4 sm:$0xff]  }
  0x2a   :  { %1286 = vmatpush1.bf16.msra.mxu0 %v2276_v14  ;;  %v2296_v28 = vld [vmem:[#allocation2 + $0x4] ss:$16 sps:$4 sm:$0xff]   ;;  %v2300_v30 = vld [vmem:[#allocation2] ss:$16 sps:$4 sm:$0xff]  }
  0x2b   :  { %1327 = vmatpush1.bf16.msra.mxu1 %v2277_v15  ;;  %1287 = vmatprep.subr.bf16.mxu0 %v2278_v16  ;;  %v2298_v29 = vld [vmem:[#allocation2 + $0x204] ss:$16 sps:$4 sm:$0xff]   ;;  %v2301_v31 = vld [vmem:[#allocation2 + $0x200] ss:$16 sps:$4 sm:$0xff]   ;;  %v2363_v15 = vld [vmem:[#allocation2 + $0xe8] ss:$16 sps:$4 sm:$0xff]  }
  0x2c   :  { %1328 = vmatprep.subr.bf16.mxu1 %v2280_v17  ;;  %v2302_v32 = vld [vmem:[#allocation2 + $0x1e4] ss:$16 sps:$4 sm:$0xff]   ;;  %v2306_v34 = vld [vmem:[#allocation2 + $0x1e0] ss:$16 sps:$4 sm:$0xff]   ;;  %v2696_v17 = vld [vmem:[%s2733_s0 + $0x18] ss:$0 sps:$4 sm:$0xff]  }
  0x2d   :  { %v2304_v33 = vld [vmem:[#allocation2 + $0x3e4] ss:$16 sps:$4 sm:$0xff]   ;;  %v2307_v35 = vld [vmem:[#allocation2 + $0x3e0] ss:$16 sps:$4 sm:$0xff]  }
  0x2e   :  { %1288 = vmatpush1.bf16.msra.mxu0 %v2282_v18  ;;  %v2308_v36 = vld [vmem:[#allocation2 + $0x1c4] ss:$16 sps:$4 sm:$0xff]   ;;  %v2312_v38 = vld [vmem:[#allocation2 + $0x1c0] ss:$16 sps:$4 sm:$0xff]   ;;  %v2372_v18 = vld [vmem:[#allocation2 + $0xcc] ss:$16 sps:$4 sm:$0xff]  }
  0x2f   :  { %1329 = vmatpush1.bf16.msra.mxu1 %v2283_v19  ;;  %1289 = vmatprep.subr.bf16.mxu0 %v2284_v20  ;;  %v2310_v37 = vld [vmem:[#allocation2 + $0x3c4] ss:$16 sps:$4 sm:$0xff]   ;;  %v2313_v39 = vld [vmem:[#allocation2 + $0x3c0] ss:$16 sps:$4 sm:$0xff]   ;;  %v2370_v20 = vld [vmem:[#allocation2 + $0xc8] ss:$16 sps:$4 sm:$0xff]  }
  0x30   :  { %1330 = vmatprep.subr.bf16.mxu1 %v2286_v21  ;;  %v2314_v40 = vld [vmem:[#allocation2 + $0x1a4] ss:$16 sps:$4 sm:$0xff]   ;;  %v2318_v42 = vld [vmem:[#allocation2 + $0x1a0] ss:$16 sps:$4 sm:$0xff]  }
  0x31   :  { %v2316_v41 = vld [vmem:[#allocation2 + $0x3a4] ss:$16 sps:$4 sm:$0xff]   ;;  %v2319_v43 = vld [vmem:[#allocation2 + $0x3a0] ss:$16 sps:$4 sm:$0xff]  }
  0x32   :  { %1290 = vmatpush1.bf16.msra.mxu0 %v2288_v22  ;;  %v2320_v44 = vld [vmem:[#allocation2 + $0x184] ss:$16 sps:$4 sm:$0xff]   ;;  %v2324_v49 = vld [vmem:[#allocation2 + $0x180] ss:$16 sps:$4 sm:$0xff]   ;;  %v2378_v22 = vld [vmem:[#allocation2 + $0xac] ss:$16 sps:$4 sm:$0xff]  }
  0x33   :  { %1331 = vmatpush1.bf16.msra.mxu1 %v2289_v23  ;;  %1291 = vmatprep.subr.bf16.mxu0 %v2290_v24  ;;  %v2322_v45 = vld [vmem:[#allocation2 + $0x384] ss:$16 sps:$4 sm:$0xff]   ;;  %v2325_v50 = vld [vmem:[#allocation2 + $0x380] ss:$16 sps:$4 sm:$0xff]   ;;  %v2376_v24 = vld [vmem:[#allocation2 + $0xa8] ss:$16 sps:$4 sm:$0xff]  }
  0x34   :  { %1332 = vmatprep.subr.bf16.mxu1 %v2292_v25  ;;  %v49_v46 = vld [vmem:[%s2733_s0] sm:$0xff] }
  0x35   :  { %v2677_v47 = vcombine.high %v49_v46, %v49_v46  ;;  %v2326_v52 = vld [vmem:[#allocation2 + $0x164] ss:$16 sps:$4 sm:$0xff]   ;;  %v2330_v54 = vld [vmem:[#allocation2 + $0x160] ss:$16 sps:$4 sm:$0xff]   ;;  %v2686_v6 = vcombine.low %v49_v46, %v49_v46  ;;  %v2406_v46 = vld [vmem:[#allocation2 + $0x8] ss:$16 sps:$4 sm:$0xff]  }
  0x36   :  { %1292 = vmatpush1.bf16.msra.mxu0 %v2294_v26  ;;  %v2328_v53 = vld [vmem:[#allocation2 + $0x364] ss:$16 sps:$4 sm:$0xff]   ;;  %v2331_v55 = vld [vmem:[#allocation2 + $0x360] ss:$16 sps:$4 sm:$0xff]   ;;  %v2384_v26 = vld [vmem:[#allocation2 + $0x8c] ss:$16 sps:$4 sm:$0xff]  }
  0x37   :  { %1333 = vmatpush1.bf16.msra.mxu1 %v2295_v27  ;;  %1293 = vmatprep.subr.bf16.mxu0 %v2296_v28  ;;  %v2332_v56 = vld [vmem:[#allocation2 + $0x144] ss:$16 sps:$4 sm:$0xff]   ;;  %v2336_v58 = vld [vmem:[#allocation2 + $0x140] ss:$16 sps:$4 sm:$0xff]   ;;  %v2382_v28 = vld [vmem:[#allocation2 + $0x88] ss:$16 sps:$4 sm:$0xff]  }
  0x38   :  { %1334 = vmatprep.subr.bf16.mxu1 %v2298_v29  ;;  %1311 = vmatprep.mubr.bf16.mxu0 %v2677_v47  ;;  %v2334_v57 = vld [vmem:[#allocation2 + $0x344] ss:$16 sps:$4 sm:$0xff]   ;;  %v2337_v59 = vld [vmem:[#allocation2 + $0x340] ss:$16 sps:$4 sm:$0xff]  }
  0x39   :  { %v2338_v60 = vld [vmem:[#allocation2 + $0x124] ss:$16 sps:$4 sm:$0xff]   ;;  %v2342_v62 = vld [vmem:[#allocation2 + $0x120] ss:$16 sps:$4 sm:$0xff]  }
  0x3a   :  { %1294 = vmatpush1.bf16.msra.mxu0 %v2300_v30  ;;  %v2340_v61 = vld [vmem:[#allocation2 + $0x324] ss:$16 sps:$4 sm:$0xff]   ;;  %v2343_v63 = vld [vmem:[#allocation2 + $0x320] ss:$16 sps:$4 sm:$0xff]   ;;  %v2390_v30 = vld [vmem:[#allocation2 + $0x6c] ss:$16 sps:$4 sm:$0xff]  }
  0x3b   :  { %1335 = vmatpush1.bf16.msra.mxu1 %v2301_v31  ;;  %1295 = vmatprep.subr.bf16.mxu0 %v2302_v32  ;;  %v2344_v0 = vld [vmem:[#allocation2 + $0x104] ss:$16 sps:$4 sm:$0xff]   ;;  %v2348_v2 = vld [vmem:[#allocation2 + $0x100] ss:$16 sps:$4 sm:$0xff]  }
  0x3c   :  { %1336 = vmatprep.subr.bf16.mxu1 %v2304_v33  ;;  %v2346_v1 = vld [vmem:[#allocation2 + $0x304] ss:$16 sps:$4 sm:$0xff]   ;;  %v2349_v3 = vld [vmem:[#allocation2 + $0x300] ss:$16 sps:$4 sm:$0xff]  }
  0x3d   :  { %v2356_v4 = vld [vmem:[#allocation2 + $0x4e4] ss:$16 sps:$4 sm:$0xff]   ;;  %v2354_v8 = vld [vmem:[#allocation2 + $0x4e0] ss:$16 sps:$4 sm:$0xff]  }
  0x3e   :  { %1296 = vmatpush2.bf16.msra.mxu0 %v2306_v34  ;;  %v2359_v5 = vld [vmem:[#allocation2 + $0x604] ss:$16 sps:$4 sm:$0xff]   ;;  %v2357_v9 = vld [vmem:[#allocation2 + $0x600] ss:$16 sps:$4 sm:$0xff]   ;;  %v2388_v34 = vld [vmem:[#allocation2 + $0x68] ss:$16 sps:$4 sm:$0xff]  }
  0x3f   :  { %1337 = vmatpush2.bf16.msra.mxu1 %v2307_v35  ;;  %1297 = vmatprep.subr.bf16.mxu0 %v2308_v36  ;;  %v2362_v10 = vld [vmem:[#allocation2 + $0x4c4] ss:$16 sps:$4 sm:$0xff]   ;;  %v2360_v12 = vld [vmem:[#allocation2 + $0x4c0] ss:$16 sps:$4 sm:$0xff]   ;;  %v2396_v36 = vld [vmem:[#allocation2 + $0x4c] ss:$16 sps:$4 sm:$0xff]  }
  0x40   :  { %1338 = vmatprep.subr.bf16.mxu1 %v2310_v37  ;;  %v2368_v14 = vld [vmem:[#allocation2 + $0x4a4] ss:$16 sps:$4 sm:$0xff]   ;;  %v2366_v16 = vld [vmem:[#allocation2 + $0x4a0] ss:$16 sps:$4 sm:$0xff]  }
  0x41   :  { %v2375_v19 = vld [vmem:[#allocation2 + $0x484] ss:$16 sps:$4 sm:$0xff]   ;;  %v2373_v21 = vld [vmem:[#allocation2 + $0x480] ss:$16 sps:$4 sm:$0xff]  }
  0x42   :  { %1298 = vmatpush2.bf16.msra.mxu0 %v2312_v38  ;;  %v2381_v23 = vld [vmem:[#allocation2 + $0x464] ss:$16 sps:$4 sm:$0xff]   ;;  %v2379_v25 = vld [vmem:[#allocation2 + $0x460] ss:$16 sps:$4 sm:$0xff]   ;;  %v2394_v38 = vld [vmem:[#allocation2 + $0x48] ss:$16 sps:$4 sm:$0xff]  }
  0x43   :  { %1339 = vmatpush2.bf16.msra.mxu1 %v2313_v39  ;;  %1299 = vmatprep.subr.bf16.mxu0 %v2314_v40  ;;  %v2387_v27 = vld [vmem:[#allocation2 + $0x444] ss:$16 sps:$4 sm:$0xff]   ;;  %v2385_v29 = vld [vmem:[#allocation2 + $0x440] ss:$16 sps:$4 sm:$0xff]   ;;  %v2402_v40 = vld [vmem:[#allocation2 + $0x2c] ss:$16 sps:$4 sm:$0xff]  }
  0x44   :  { %1340 = vmatprep.subr.bf16.mxu1 %v2316_v41  ;;  %v2393_v31 = vld [vmem:[#allocation2 + $0x424] ss:$16 sps:$4 sm:$0xff]   ;;  %v2391_v35 = vld [vmem:[#allocation2 + $0x420] ss:$16 sps:$4 sm:$0xff]  }
  0x45   :  { %v2704_v32 = vld [vmem:[%s2733_s0 + $0x10] sm:$0xff] }
  0x46   :  { %1300 = vmatpush2.bf16.msra.mxu0 %v2318_v42  ;;  %v2708_v33 = vcombine.high %v2704_v32, %v2704_v32  ;;  %v2399_v37 = vld [vmem:[#allocation2 + $0x404] ss:$16 sps:$4 sm:$0xff]   ;;  %v2397_v39 = vld [vmem:[#allocation2 + $0x400] ss:$16 sps:$4 sm:$0xff]   ;;  %v2400_v42 = vld [vmem:[#allocation2 + $0x28] ss:$16 sps:$4 sm:$0xff]  }
  0x47   :  { %1341 = vmatpush2.bf16.msra.mxu1 %v2319_v43  ;;  %1301 = vmatprep.subr.bf16.mxu0 %v2320_v44  ;;  %v2405_v41 = vld [vmem:[#allocation2 + $0x5e4] ss:$16 sps:$4 sm:$0xff]   ;;  %v2403_v43 = vld [vmem:[#allocation2 + $0x5e0] ss:$16 sps:$4 sm:$0xff]   ;;  %v2408_v44 = vld [vmem:[#allocation2 + $0xc] ss:$16 sps:$4 sm:$0xff]  }
  0x48   :  { %1342 = vmatprep.subr.bf16.mxu1 %v2322_v45  ;;  %v2411_v45 = vld [vmem:[#allocation2 + $0x5c4] ss:$16 sps:$4 sm:$0xff]  }
  0x4a   :  { %1302 = vmatpush2.bf16.msra.mxu0 %v2324_v49  ;;  %v2417_v49 = vld [vmem:[#allocation2 + $0x5a4] ss:$16 sps:$4 sm:$0xff]  }
  0x4b   :  { %1343 = vmatpush2.bf16.msra.mxu1 %v2325_v50  ;;  %1303 = vmatprep.subr.bf16.mxu0 %v2326_v52  ;;  %v2412_v50 = vld [vmem:[#allocation2 + $0x1e8] ss:$16 sps:$4 sm:$0xff]   ;;  %v2415_v52 = vld [vmem:[#allocation2 + $0x5a0] ss:$16 sps:$4 sm:$0xff]  }
  0x4c   :  { %1344 = vmatprep.subr.bf16.mxu1 %v2328_v53  ;;  %v2420_v53 = vld [vmem:[#allocation2 + $0x1cc] ss:$16 sps:$4 sm:$0xff]  }
  0x4e   :  { %1304 = vmatpush2.bf16.msra.mxu0 %v2330_v54  ;;  %v2423_v54 = vld [vmem:[#allocation2 + $0x584] ss:$16 sps:$4 sm:$0xff]  }
  0x4f   :  { %1345 = vmatpush2.bf16.msra.mxu1 %v2331_v55  ;;  %1305 = vmatprep.subr.bf16.mxu0 %v2332_v56  ;;  %v2418_v55 = vld [vmem:[#allocation2 + $0x1c8] ss:$16 sps:$4 sm:$0xff]   ;;  %v2421_v56 = vld [vmem:[#allocation2 + $0x580] ss:$16 sps:$4 sm:$0xff]  }
  0x50   :  { %1346 = vmatprep.subr.bf16.mxu1 %v2334_v57  ;;  %v2426_v57 = vld [vmem:[#allocation2 + $0x1ac] ss:$16 sps:$4 sm:$0xff]  }
  0x52   :  { %1306 = vmatpush2.bf16.msra.mxu0 %v2336_v58  ;;  %v2429_v58 = vld [vmem:[#allocation2 + $0x564] ss:$16 sps:$4 sm:$0xff]  }
  0x53   :  { %1347 = vmatpush2.bf16.msra.mxu1 %v2337_v59  ;;  %1307 = vmatprep.subr.bf16.mxu0 %v2338_v60  ;;  %v2424_v59 = vld [vmem:[#allocation2 + $0x1a8] ss:$16 sps:$4 sm:$0xff]   ;;  %v2427_v60 = vld [vmem:[#allocation2 + $0x560] ss:$16 sps:$4 sm:$0xff]  }
  0x54   :  { %1348 = vmatprep.subr.bf16.mxu1 %v2340_v61  ;;  %v2432_v61 = vld [vmem:[#allocation2 + $0x18c] ss:$16 sps:$4 sm:$0xff]  }
  0x56   :  { %1308 = vmatpush2.bf16.msra.mxu0 %v2342_v62  ;;  %v2435_v62 = vld [vmem:[#allocation2 + $0x544] ss:$16 sps:$4 sm:$0xff]  }
  0x57   :  { %1349 = vmatpush2.bf16.msra.mxu1 %v2343_v63  ;;  %1309 = vmatprep.subr.bf16.mxu0 %v2344_v0  ;;  %v2430_v63 = vld [vmem:[#allocation2 + $0x188] ss:$16 sps:$4 sm:$0xff]   ;;  %v2433_v0 = vld [vmem:[#allocation2 + $0x540] ss:$16 sps:$4 sm:$0xff]  }
  0x58   :  { %1350 = vmatprep.subr.bf16.mxu1 %v2346_v1  ;;  %v2438_v1 = vld [vmem:[#allocation2 + $0x16c] ss:$16 sps:$4 sm:$0xff]  }
  0x5a   :  { %1310 = vmatpush2.bf16.msra.mxu0 %v2348_v2  ;;  %v2441_v2 = vld [vmem:[#allocation2 + $0x524] ss:$16 sps:$4 sm:$0xff]  }
  0x5b   :  { %1351 = vmatpush2.bf16.msra.mxu1 %v2349_v3  ;;  %1361 = vmatprep.subr.bf16.mxu0 %v2356_v4  ;;  %v2436_v3 = vld [vmem:[#allocation2 + $0x168] ss:$16 sps:$4 sm:$0xff]   ;;  %v2439_v4 = vld [vmem:[#allocation2 + $0x520] ss:$16 sps:$4 sm:$0xff]  }
  0x5c   :  { %1416 = vmatprep.subr.bf16.mxu1 %v2359_v5  ;;  %v2444_v5 = vld [vmem:[#allocation2 + $0x14c] ss:$16 sps:$4 sm:$0xff]  }
  0x5d   :  { %1312 = vmatmul.mubr.bf16.vlgmr.msra.gmra.mxu0 %v2686_v6 }
  0x5e   :  { %1353 = vmatmul.mubr.bf16.vlgmr.msra.gmra.mxu1 %v2688_v7  ;;  %1362 = vmatpush1.bf16.msra.mxu0 %v2354_v8  ;;  %v2447_v8 = vld [vmem:[#allocation2 + $0x504] ss:$16 sps:$4 sm:$0xff]  }
  0x5f   :  { %1417 = vmatpush1.bf16.msra.mxu1 %v2357_v9  ;;  %1363 = vmatprep.subr.bf16.mxu0 %v2362_v10  ;;  %v2442_v9 = vld [vmem:[#allocation2 + $0x148] ss:$16 sps:$4 sm:$0xff]   ;;  %v2445_v10 = vld [vmem:[#allocation2 + $0x500] ss:$16 sps:$4 sm:$0xff]  }
  0x60   :  { %1434 = vmatprep.mubr.bf16.mxu1 %v2637_v13  ;;  %1443 = vmatprep.subr.bf16.mxu1 %v2365_v11  ;;  %v2452_v11 = vld [vmem:[#allocation2 + $0x12c] ss:$16 sps:$4 sm:$0xff]  }
  0x61   :  { %1393 = vmatprep.mubr.bf16.mxu0 %v2708_v33 }
  0x62   :  { %1364 = vmatpush1.bf16.msra.mxu0 %v2360_v12  ;;  %v2455_v12 = vld [vmem:[#allocation2 + $0x2ec] ss:$16 sps:$4 sm:$0xff]  }
  0x63   :  { %1365 = vmatprep.subr.bf16.mxu0 %v2368_v14  ;;  %v2713_v14 = vcombine.low %v2704_v32, %v2704_v32  ;;  %v2474_v32 = vld [vmem:[#allocation2 + $0x4a8] ss:$16 sps:$4 sm:$0xff]  }
  0x66   :  { %2168 = vmatmul.mubr.msk.bf16.vlgmr.msra.gmra.mxu1 %vm1275_vm0, %v2696_v17  ;;  %1366 = vmatpush1.bf16.msra.mxu0 %v2366_v16  ;;  %v2453_v16 = vld [vmem:[#allocation2 + $0x2e8] ss:$16 sps:$4 sm:$0xff]  }
  0x67   :  { %1444 = vmatpush1.bf16.msra.mxu1 %v2363_v15  ;;  %1367 = vmatprep.subr.bf16.mxu0 %v2375_v19  ;;  %v2450_v15 = vld [vmem:[#allocation2 + $0x128] ss:$16 sps:$4 sm:$0xff]   ;;  %v2461_v19 = vld [vmem:[#allocation2 + $0x2cc] ss:$16 sps:$4 sm:$0xff]  }
  0x68   :  { %1445 = vmatprep.subr.bf16.mxu1 %v2372_v18  ;;  %1475 = vmatprep.mubr.bf16.mxu1 %v2677_v47  ;;  %v2409_v47 = vld [vmem:[#allocation2 + $0x5c0] ss:$16 sps:$4 sm:$0xff]   ;;  %v2458_v18 = vld [vmem:[#allocation2 + $0x10c] ss:$16 sps:$4 sm:$0xff]  }
  0x6a   :  { %1368 = vmatpush1.bf16.msra.mxu0 %v2373_v21  ;;  %v2459_v21 = vld [vmem:[#allocation2 + $0x2c8] ss:$16 sps:$4 sm:$0xff]  }
  0x6b   :  { %1446 = vmatpush1.bf16.msra.mxu1 %v2370_v20  ;;  %1369 = vmatprep.subr.bf16.mxu0 %v2381_v23  ;;  %v2456_v20 = vld [vmem:[#allocation2 + $0x108] ss:$16 sps:$4 sm:$0xff]   ;;  %v2467_v23 = vld [vmem:[#allocation2 + $0x2ac] ss:$16 sps:$4 sm:$0xff]  }
  0x6c   :  { %1447 = vmatprep.subr.bf16.mxu1 %v2378_v22  ;;  %v2464_v22 = vld [vmem:[#allocation2 + $0x4ec] ss:$16 sps:$4 sm:$0xff]  }
  0x6e   :  { %1370 = vmatpush1.bf16.msra.mxu0 %v2379_v25  ;;  %v2465_v25 = vld [vmem:[#allocation2 + $0x2a8] ss:$16 sps:$4 sm:$0xff]  }
  0x6f   :  { %1448 = vmatpush1.bf16.msra.mxu1 %v2376_v24  ;;  %1371 = vmatprep.subr.bf16.mxu0 %v2387_v27  ;;  %v2462_v24 = vld [vmem:[#allocation2 + $0x4e8] ss:$16 sps:$4 sm:$0xff]   ;;  %v2473_v27 = vld [vmem:[#allocation2 + $0x28c] ss:$16 sps:$4 sm:$0xff]  }
  0x70   :  { %1449 = vmatprep.subr.bf16.mxu1 %v2384_v26  ;;  %v2470_v26 = vld [vmem:[#allocation2 + $0x4cc] ss:$16 sps:$4 sm:$0xff]  }
  0x72   :  { %1372 = vmatpush1.bf16.msra.mxu0 %v2385_v29  ;;  %v2471_v29 = vld [vmem:[#allocation2 + $0x288] ss:$16 sps:$4 sm:$0xff]  }
  0x73   :  { %1450 = vmatpush1.bf16.msra.mxu1 %v2382_v28  ;;  %1373 = vmatprep.subr.bf16.mxu0 %v2393_v31  ;;  %v2468_v28 = vld [vmem:[#allocation2 + $0x4c8] ss:$16 sps:$4 sm:$0xff]   ;;  %v2479_v31 = vld [vmem:[#allocation2 + $0x26c] ss:$16 sps:$4 sm:$0xff]  }
  0x74   :  { %1451 = vmatprep.subr.bf16.mxu1 %v2390_v30  ;;  %v2476_v30 = vld [vmem:[#allocation2 + $0x4ac] ss:$16 sps:$4 sm:$0xff]  }
  0x76   :  { %1374 = vmatpush1.bf16.msra.mxu0 %v2391_v35  ;;  %v2485_v35 = vld [vmem:[#allocation2 + $0x24c] ss:$16 sps:$4 sm:$0xff]  }
  0x77   :  { %1452 = vmatpush1.bf16.msra.mxu1 %v2388_v34  ;;  %1375 = vmatprep.subr.bf16.mxu0 %v2399_v37  ;;  %v2477_v34 = vld [vmem:[#allocation2 + $0x268] ss:$16 sps:$4 sm:$0xff]  }
  0x78   :  { %1453 = vmatprep.subr.bf16.mxu1 %v2396_v36  ;;  %v2480_v36 = vld [vmem:[#allocation2 + $0x488] ss:$16 sps:$4 sm:$0xff]  }
  0x79   :  { %v2483_v37 = vld [vmem:[#allocation2 + $0x248] ss:$16 sps:$4 sm:$0xff]  }
  0x7a   :  { %1376 = vmatpush1.bf16.msra.mxu0 %v2397_v39  ;;  %v2486_v39 = vld [vmem:[#allocation2 + $0x468] ss:$16 sps:$4 sm:$0xff]  }
  0x7b   :  { %1454 = vmatpush1.bf16.msra.mxu1 %v2394_v38  ;;  %1377 = vmatprep.subr.bf16.mxu0 %v2405_v41  ;;  %v2488_v38 = vld [vmem:[#allocation2 + $0x46c] ss:$16 sps:$4 sm:$0xff]  }
  0x7c   :  { %1455 = vmatprep.subr.bf16.mxu1 %v2402_v40  ;;  %v2489_v40 = vld [vmem:[#allocation2 + $0x228] ss:$16 sps:$4 sm:$0xff]   ;;  %v2494_v41 = vld [vmem:[#allocation2 + $0x44c] ss:$16 sps:$4 sm:$0xff]  }
  0x7e   :  { %1378 = vmatpush2.bf16.msra.mxu0 %v2403_v43  ;;  %v2495_v43 = vld [vmem:[#allocation2 + $0x208] ss:$16 sps:$4 sm:$0xff]  }
  0x7f   :  { %1456 = vmatpush1.bf16.msra.mxu1 %v2400_v42  ;;  %1379 = vmatprep.subr.bf16.mxu0 %v2411_v45  ;;  %v2497_v42 = vld [vmem:[#allocation2 + $0x20c] ss:$16 sps:$4 sm:$0xff]  }
  0x80   :  { %1457 = vmatprep.subr.bf16.mxu1 %v2408_v44  ;;  %v2500_v44 = vld [vmem:[#allocation2 + $0x42c] ss:$16 sps:$4 sm:$0xff]  }
  0x81   :  { %v2503_v45 = vld [vmem:[#allocation2 + $0x3ec] ss:$16 sps:$4 sm:$0xff]  }
  0x82   :  { %1380 = vmatpush2.bf16.msra.mxu0 %v2409_v47  ;;  %v2501_v47 = vld [vmem:[#allocation2 + $0x3e8] ss:$16 sps:$4 sm:$0xff]  }
  0x83   :  { %1458 = vmatpush1.bf16.msra.mxu1 %v2406_v46  ;;  %1381 = vmatprep.subr.bf16.mxu0 %v2417_v49  ;;  %v2498_v46 = vld [vmem:[#allocation2 + $0x428] ss:$16 sps:$4 sm:$0xff]   ;;  %v2509_v49 = vld [vmem:[#allocation2 + $0x3cc] ss:$16 sps:$4 sm:$0xff]  }
  0x84   :  { %1459 = vmatprep.subr.bf16.mxu1 %v2414_v48  ;;  %v2506_v48 = vld [vmem:[#allocation2 + $0x40c] ss:$16 sps:$4 sm:$0xff]  }
  0x86   :  { %1382 = vmatpush2.bf16.msra.mxu0 %v2415_v52  ;;  %v2507_v52 = vld [vmem:[#allocation2 + $0x3c8] ss:$16 sps:$4 sm:$0xff]  }
  0x87   :  { %1460 = vmatpush2.bf16.msra.mxu1 %v2412_v50  ;;  %1383 = vmatprep.subr.bf16.mxu0 %v2423_v54  ;;  %v2504_v50 = vld [vmem:[#allocation2 + $0x408] ss:$16 sps:$4 sm:$0xff]   ;;  %v2515_v54 = vld [vmem:[#allocation2 + $0x3ac] ss:$16 sps:$4 sm:$0xff]  }
  0x88   :  { %1461 = vmatprep.subr.bf16.mxu1 %v2420_v53  ;;  %v2512_v53 = vld [vmem:[#allocation2 + $0x5ec] ss:$16 sps:$4 sm:$0xff]  }
  0x8a   :  { %1384 = vmatpush2.bf16.msra.mxu0 %v2421_v56  ;;  %v2513_v56 = vld [vmem:[#allocation2 + $0x3a8] ss:$16 sps:$4 sm:$0xff]  }
  0x8b   :  { %1462 = vmatpush2.bf16.msra.mxu1 %v2418_v55  ;;  %1385 = vmatprep.subr.bf16.mxu0 %v2429_v58  ;;  %v2510_v55 = vld [vmem:[#allocation2 + $0x5e8] ss:$16 sps:$4 sm:$0xff]   ;;  %v2521_v58 = vld [vmem:[#allocation2 + $0x38c] ss:$16 sps:$4 sm:$0xff]  }
  0x8c   :  { %1463 = vmatprep.subr.bf16.mxu1 %v2426_v57  ;;  %v2518_v57 = vld [vmem:[#allocation2 + $0x5cc] ss:$16 sps:$4 sm:$0xff]  }
  0x8e   :  { %1386 = vmatpush2.bf16.msra.mxu0 %v2427_v60  ;;  %v2519_v60 = vld [vmem:[#allocation2 + $0x388] ss:$16 sps:$4 sm:$0xff]  }
  0x8f   :  { %1464 = vmatpush2.bf16.msra.mxu1 %v2424_v59  ;;  %1387 = vmatprep.subr.bf16.mxu0 %v2435_v62  ;;  %v2516_v59 = vld [vmem:[#allocation2 + $0x5c8] ss:$16 sps:$4 sm:$0xff]   ;;  %v2527_v62 = vld [vmem:[#allocation2 + $0x36c] ss:$16 sps:$4 sm:$0xff]  }
  0x90   :  { %1465 = vmatprep.subr.bf16.mxu1 %v2432_v61  ;;  %v2524_v61 = vld [vmem:[#allocation2 + $0x5ac] ss:$16 sps:$4 sm:$0xff]  }
  0x92   :  { %1388 = vmatpush2.bf16.msra.mxu0 %v2433_v0  ;;  %v2525_v0 = vld [vmem:[#allocation2 + $0x368] ss:$16 sps:$4 sm:$0xff]  }
  0x93   :  { %1466 = vmatpush2.bf16.msra.mxu1 %v2430_v63  ;;  %1389 = vmatprep.subr.bf16.mxu0 %v2441_v2  ;;  %v2522_v63 = vld [vmem:[#allocation2 + $0x5a8] ss:$16 sps:$4 sm:$0xff]   ;;  %v2533_v2 = vld [vmem:[#allocation2 + $0x34c] ss:$16 sps:$4 sm:$0xff]  }
  0x94   :  { %1467 = vmatprep.subr.bf16.mxu1 %v2438_v1  ;;  %v2530_v1 = vld [vmem:[#allocation2 + $0x58c] ss:$16 sps:$4 sm:$0xff]  }
  0x96   :  { %1390 = vmatpush2.bf16.msra.mxu0 %v2439_v4  ;;  %v2531_v4 = vld [vmem:[#allocation2 + $0x348] ss:$16 sps:$4 sm:$0xff]  }
  0x97   :  { %1468 = vmatpush2.bf16.msra.mxu1 %v2436_v3  ;;  %1391 = vmatprep.subr.bf16.mxu0 %v2447_v8  ;;  %v2528_v3 = vld [vmem:[#allocation2 + $0x588] ss:$16 sps:$4 sm:$0xff]   ;;  %v2539_v8 = vld [vmem:[#allocation2 + $0x32c] ss:$16 sps:$4 sm:$0xff]  }
  0x98   :  { %1469 = vmatprep.subr.bf16.mxu1 %v2444_v5  ;;  %v2536_v5 = vld [vmem:[#allocation2 + $0x56c] ss:$16 sps:$4 sm:$0xff]  }
  0x9a   :  { %1392 = vmatpush2.bf16.msra.mxu0 %v2445_v10  ;;  %v2537_v10 = vld [vmem:[#allocation2 + $0x328] ss:$16 sps:$4 sm:$0xff]  }
  0x9b   :  { %1470 = vmatpush2.bf16.msra.mxu1 %v2442_v9  ;;  %1484 = vmatprep.subr.bf16.mxu0 %v2455_v12  ;;  %v2534_v9 = vld [vmem:[#allocation2 + $0x568] ss:$16 sps:$4 sm:$0xff]   ;;  %v2545_v12 = vld [vmem:[#allocation2 + $0x30c] ss:$16 sps:$4 sm:$0xff]  }
  0x9c   :  { %1471 = vmatprep.subr.bf16.mxu1 %v2452_v11  ;;  %v2542_v11 = vld [vmem:[#allocation2 + $0x54c] ss:$16 sps:$4 sm:$0xff]  }
  0x9d   :  { %1394 = vmatmul.mubr.bf16.vlgmr.msra.gmra.mxu0 %v2713_v14 }
  0x9e   :  { %1485 = vmatpush1.bf16.msra.mxu0 %v2453_v16  ;;  %1516 = vmatprep.mubr.bf16.mxu0 %v2682_v51  ;;  %v2482_v51 = vld [vmem:[#allocation2 + $0x48c] ss:$16 sps:$4 sm:$0xff]   ;;  %v2543_v16 = vld [vmem:[#allocation2 + $0x308] ss:$16 sps:$4 sm:$0xff]  }
  0x9f   :  { %1472 = vmatpush2.bf16.msra.mxu1 %v2450_v15  ;;  %1486 = vmatprep.subr.bf16.mxu0 %v2461_v19  ;;  %v2540_v15 = vld [vmem:[#allocation2 + $0x548] ss:$16 sps:$4 sm:$0xff]   ;;  %v2551_v19 = vld [vmem:[#allocation2 + $0x60c] ss:$16 sps:$4 sm:$0xff]  }
  0xa0   :  { %1473 = vmatprep.subr.bf16.mxu1 %v2458_v18  ;;  %v2548_v18 = vld [vmem:[#allocation2 + $0x52c] ss:$16 sps:$4 sm:$0xff]  }
  0xa2   :  { %1487 = vmatpush1.bf16.msra.mxu0 %v2459_v21  ;;  %v2549_v21 = vld [vmem:[#allocation2 + $0x608] ss:$16 sps:$4 sm:$0xff]  }
  0xa3   :  { %1474 = vmatpush2.bf16.msra.mxu1 %v2456_v20  ;;  %1488 = vmatprep.subr.bf16.mxu0 %v2467_v23  ;;  %v2546_v20 = vld [vmem:[#allocation2 + $0x528] ss:$16 sps:$4 sm:$0xff]  }
  0xa4   :  { %1525 = vmatprep.subr.bf16.mxu1 %v2464_v22  ;;  %v2554_v22 = vld [vmem:[#allocation2 + $0x50c] ss:$16 sps:$4 sm:$0xff]  }
  0xa5   :  { %v2555_v23 = vld [vmem:[#allocation4 + $0x78] sm:$0xff]  }
  0xa6   :  { %1476 = vmatmul.mubr.bf16.vlgmr.msra.gmra.mxu1 %v2686_v6  ;;  %1489 = vmatpush1.bf16.msra.mxu0 %v2465_v25  ;;  %v2491_v6 = vld [vmem:[#allocation2 + $0x22c] ss:$16 sps:$4 sm:$0xff]  }
  0xa7   :  { %1526 = vmatpush1.bf16.msra.mxu1 %v2462_v24  ;;  %1490 = vmatprep.subr.bf16.mxu0 %v2473_v27  ;;  %v2552_v24 = vld [vmem:[#allocation2 + $0x508] ss:$16 sps:$4 sm:$0xff]   ;;  %v2558_v27 = vld [vmem:[#allocation4 + $0x30] sm:$0xff]  }
  0xa8   :  { %1527 = vmatprep.subr.bf16.mxu1 %v2470_v26  ;;  %1557 = vmatprep.mubr.bf16.mxu1 %v2708_v33  ;;  %v2492_v33 = vld [vmem:[#allocation2 + $0x448] ss:$16 sps:$4 sm:$0xff]   ;;  %v2557_v26 = vld [vmem:[#allocation4 + $0x70] sm:$0xff]  }
  0xa9   :  { %v2556_v25 = vld [vmem:[#allocation4 + $0x38] sm:$0xff]  }
  0xaa   :  { %1491 = vmatpush1.bf16.msra.mxu0 %v2471_v29  ;;  %v2561_v29 = vld [vmem:[#allocation4 + $0x60] sm:$0xff]  }
  0xab   :  { %1528 = vmatpush1.bf16.msra.mxu1 %v2468_v28  ;;  %1492 = vmatprep.subr.bf16.mxu0 %v2479_v31  ;;  %v2559_v28 = vld [vmem:[#allocation4 + $0x68] sm:$0xff]   ;;  %v2572_v31 = vld [vmem:[#allocation4 + $0xb8] sm:$0xff]  }
  0xac   :  { %1529 = vmatprep.subr.bf16.mxu1 %v2476_v30  ;;  %v2571_v30 = vld [vmem:[#allocation4 + $0xf8] sm:$0xff]  }
  0xae   :  { %1493 = vmatpush1.bf16.msra.mxu0 %v2477_v34  ;;  %v2574_v34 = vld [vmem:[#allocation4 + $0xb0] sm:$0xff]  }
  0xaf   :  { %1530 = vmatpush1.bf16.msra.mxu1 %v2474_v32  ;;  %1494 = vmatprep.subr.bf16.mxu0 %v2485_v35  ;;  %v2562_v32 = vld [vmem:[#allocation4 + $0x20] sm:$0xff]   ;;  %v2576_v35 = vld [vmem:[#allocation4 + $0xa8] sm:$0xff]  }
  0xb0   :  { %1531 = vmatprep.subr.bf16.mxu1 %v2482_v51  ;;  %v2564_v51 = vld [vmem:[#allocation4 + $0x18] sm:$0xff]  }
  0xb2   :  { %1495 = vmatpush1.bf16.msra.mxu0 %v2483_v37  ;;  %v2577_v37 = vld [vmem:[#allocation4 + $0xe0] sm:$0xff]  }
  0xb3   :  { %1532 = vmatpush1.bf16.msra.mxu1 %v2480_v36  ;;  %1496 = vmatprep.subr.bf16.mxu0 %v2491_v6  ;;  %v2565_v36 = vld [vmem:[#allocation4 + $0x50] sm:$0xff]   ;;  %v2567_v6 = vld [vmem:[#allocation4 + $0x48] sm:$0xff]  }
  0xb4   :  { %1533 = vmatprep.subr.bf16.mxu1 %v2488_v38  ;;  %v2566_v38 = vld [vmem:[#allocation4 + $0x10] sm:$0xff]  }
  0xb6   :  { %1497 = vmatpush1.bf16.msra.mxu0 %v2489_v40  ;;  %v2569_v40 = vld [vmem:[#allocation4 + $0x40] sm:$0xff]  }
  0xb7   :  { %1534 = vmatpush1.bf16.msra.mxu1 %v2486_v39  ;;  %1498 = vmatprep.subr.bf16.mxu0 %v2497_v42  ;;  %v2568_v39 = vld [vmem:[#allocation4 + $0x8] sm:$0xff]   ;;  %v2578_v42 = vld [vmem:[#allocation4 + $0xa0] sm:$0xff]  }
  0xb8   :  { %1535 = vmatprep.subr.bf16.mxu1 %v2494_v41  ;;  %v2570_v41 = vld [vmem:[#allocation4] sm:$0xff]  }
  0xba   :  { %1499 = vmatpush1.bf16.msra.mxu0 %v2495_v43 }
  0xbb   :  { %1536 = vmatpush1.bf16.msra.mxu1 %v2492_v33  ;;  %1500 = vmatprep.subr.bf16.mxu0 %v2503_v45 }
  0xbc   :  { %1537 = vmatprep.subr.bf16.mxu1 %v2500_v44 }
  0xbe   :  { %1501 = vmatpush2.bf16.msra.mxu0 %v2501_v47  ;;  %v2580_v47 = vld [vmem:[#allocation4 + $0x98] sm:$0xff]  }
  0xbf   :  { %1538 = vmatpush1.bf16.msra.mxu1 %v2498_v46  ;;  %1502 = vmatprep.subr.bf16.mxu0 %v2509_v49  ;;  %v2579_v46 = vld [vmem:[#allocation4 + $0xd8] sm:$0xff]  }
  0xc0   :  { %1539 = vmatprep.subr.bf16.mxu1 %v2506_v48 }
  0xc2   :  { %1503 = vmatpush2.bf16.msra.mxu0 %v2507_v52 }
  0xc3   :  { %1540 = vmatpush1.bf16.msra.mxu1 %v2504_v50  ;;  %1504 = vmatprep.subr.bf16.mxu0 %v2515_v54  ;;  %v2582_v54 = vld [vmem:[#allocation4 + $0x90] sm:$0xff]  }
  0xc4   :  { %1541 = vmatprep.subr.bf16.mxu1 %v2512_v53  ;;  %v2581_v53 = vld [vmem:[#allocation4 + $0xd0] sm:$0xff]  }
  0xc6   :  { %1505 = vmatpush2.bf16.msra.mxu0 %v2513_v56 }
  0xc7   :  { %1542 = vmatpush2.bf16.msra.mxu1 %v2510_v55  ;;  %1506 = vmatprep.subr.bf16.mxu0 %v2521_v58  ;;  %v2584_v58 = vld [vmem:[#allocation4 + $0x88] sm:$0xff]  }
  0xc8   :  { %1543 = vmatprep.subr.bf16.mxu1 %v2518_v57  ;;  %v2583_v57 = vld [vmem:[#allocation4 + $0xc8] sm:$0xff]  }
  0xca   :  { %1507 = vmatpush2.bf16.msra.mxu0 %v2519_v60 }
  0xcb   :  { %1544 = vmatpush2.bf16.msra.mxu1 %v2516_v59  ;;  %1508 = vmatprep.subr.bf16.mxu0 %v2527_v62  ;;  %v2586_v62 = vld [vmem:[#allocation4 + $0x80] sm:$0xff]  }
  0xcc   :  { %1545 = vmatprep.subr.bf16.mxu1 %v2524_v61  ;;  %v2585_v61 = vld [vmem:[#allocation4 + $0xc0] sm:$0xff]  }
  0xce   :  { %1509 = vmatpush2.bf16.msra.mxu0 %v2525_v0 }
  0xcf   :  { %1546 = vmatpush2.bf16.msra.mxu1 %v2522_v63  ;;  %1510 = vmatprep.subr.bf16.mxu0 %v2533_v2  ;;  %v251_v63 = vlaneseq  ;;  %v249_v2 = vld [vmem:[%s2735_s2] sm:$0xf] }
  0xd0   :  { %1547 = vmatprep.subr.bf16.mxu1 %v2530_v1 }
  0xd1   :  { %v252_v0 = vshrl.u32 %v251_v63, 7 }
  0xd2   :  { %1511 = vmatpush2.bf16.msra.mxu0 %v2531_v4 }
  0xd3   :  { %1548 = vmatpush2.bf16.msra.mxu1 %v2528_v3  ;;  %1512 = vmatprep.subr.bf16.mxu0 %v2539_v8  ;;  %v253_v1 = vsub.s32 0, %v252_v0  ;;  %v257_v3 = vsub.s32 1, %v252_v0 }
  0xd4   :  { %1549 = vmatprep.subr.bf16.mxu1 %v2536_v5 }
  0xd5   :  { %v254_v4 = vrot.slane %v249_v2, %v253_v1  ;;  %v258_v5 = vrot.slane %v249_v2, %v257_v3 }
  0xd6   :  { %1513 = vmatpush2.bf16.msra.mxu0 %v2537_v10 }
  0xd7   :  { %1550 = vmatpush2.bf16.msra.mxu1 %v2534_v9  ;;  %1514 = vmatprep.subr.bf16.mxu0 %v2545_v12 }
  0xd8   :  { %1551 = vmatprep.subr.bf16.mxu1 %v2542_v11 }
  0xda   :  { %1515 = vmatpush2.bf16.msra.mxu0 %v2543_v16 }
  0xdb   :  { %1552 = vmatpush2.bf16.msra.mxu1 %v2540_v15  ;;  %1580 = vmatprep.subr.bf16.mxu0 %v2551_v19 }
  0xdc   :  { %1553 = vmatprep.subr.bf16.mxu1 %v2548_v18 }
  0xdd   :  { %1517 = vmatmul.mubr.bf16.vlgmr.msra.gmra.mxu0 %v2688_v7  ;;  %v2560_v7 = vld [vmem:[#allocation4 + $0x28] sm:$0xff]  }
  0xde   :  { %1581 = vmatpush1.bf16.msra.mxu0 %v2549_v21  ;;  %1598 = vmatprep.mubr.bf16.mxu0 %v2637_v13  ;;  %v2573_v13 = vld [vmem:[#allocation4 + $0xf0] sm:$0xff]  }
  0xdf   :  { %1554 = vmatpush2.bf16.msra.mxu1 %v2546_v20  ;;  %2203 = vmatprep.subr.bf16.mxu0 %v2555_v23 }
  0xe0   :  { %1555 = vmatprep.subr.bf16.mxu1 %v2554_v22 }
  0xe3   :  { %1556 = vmatpush2.bf16.msra.mxu1 %v2552_v24 }
  0xe4   :  { %2225 = vmatprep.subr.bf16.mxu1 %v2571_v30  ;;  %v261_v30 = vsub.s32 2, %v252_v0 }
  0xe5   :  { %2169 = vmatmul.mubr.msk.bf16.vlgmr.msra.gmra.mxu0 %vm1275_vm0, %v2696_v17  ;;  %v2575_v17 = vld [vmem:[#allocation4 + $0xe8] sm:$0xff]  }
  0xe6   :  { %1558 = vmatmul.mubr.bf16.vlgmr.msra.gmra.mxu1 %v2713_v14  ;;  %2204 = vmatpush3.bf16.msra.mxu0 %v2556_v25  ;;  %v2563_v14 = vld [vmem:[#allocation4 + $0x58] sm:$0xff]  }
  0xe7   :  { %2205 = vmatprep.subr.bf16.mxu0 %v2557_v26  ;;  %2226 = vmatpush3.bf16.msra.mxu1 %v2572_v31  ;;  %v265_v31 = vsub.s32 3, %v252_v0 }
  0xe8   :  { %2227 = vmatprep.subr.bf16.mxu1 %v2573_v13 }
  0xea   :  { %2206 = vmatpush3.bf16.msra.mxu0 %v2558_v27 }
  0xeb   :  { %2207 = vmatprep.subr.bf16.mxu0 %v2559_v28  ;;  %2228 = vmatpush3.bf16.msra.mxu1 %v2574_v34 }
  0xec   :  { %2229 = vmatprep.subr.bf16.mxu1 %v2575_v17 }
  0xee   :  { %2208 = vmatpush3.bf16.msra.mxu0 %v2560_v7 }
  0xef   :  { %2209 = vmatprep.subr.bf16.mxu0 %v2561_v29  ;;  %2230 = vmatpush3.bf16.msra.mxu1 %v2576_v35 }
  0xf0   :  { %2231 = vmatprep.subr.bf16.mxu1 %v2577_v37 }
  0xf2   :  { %2210 = vmatpush3.bf16.msra.mxu0 %v2562_v32  ;;  %v262_v32 = vrot.slane %v249_v2, %v261_v30 }
  0xf3   :  { %2211 = vmatprep.subr.bf16.mxu0 %v2563_v14  ;;  %2232 = vmatpush3.bf16.msra.mxu1 %v2578_v42  ;;  %v266_v14 = vrot.slane %v249_v2, %v265_v31 }
  0xf4   :  { %2233 = vmatprep.subr.bf16.mxu1 %v2579_v46 }
  0xf6   :  { %2212 = vmatpush3.bf16.msra.mxu0 %v2564_v51 }
  0xf7   :  { %2213 = vmatprep.subr.bf16.mxu0 %v2565_v36  ;;  %2234 = vmatpush3.bf16.msra.mxu1 %v2580_v47 }
  0xf8   :  { %2235 = vmatprep.subr.bf16.mxu1 %v2581_v53 }
  0xfa   :  { %2214 = vmatpush3.bf16.msra.mxu0 %v2566_v38 }
  0xfb   :  { %2215 = vmatprep.subr.bf16.mxu0 %v2567_v6  ;;  %2236 = vmatpush3.bf16.msra.mxu1 %v2582_v54 }
  0xfc   :  { %2237 = vmatprep.subr.bf16.mxu1 %v2583_v57 }
  0xfe   :  { %2216 = vmatpush3.bf16.msra.mxu0 %v2568_v39 }
  0xff   :  { %2217 = vmatprep.subr.bf16.mxu0 %v2569_v40  ;;  %2238 = vmatpush3.bf16.msra.mxu1 %v2584_v58 }
 0x100   :  { %2239 = vmatprep.subr.bf16.mxu1 %v2585_v61 }
 0x102   :  { %2218 = vmatpush3.bf16.msra.mxu0 %v2570_v41 }
 0x103   :  { %2240 = vmatpush3.bf16.msra.mxu1 %v2586_v62 }
 0x11d   :  { %v1313_v33 = vpop.f32.mrf.mxu0 }
 0x11e   :  { %v1354_v43 = vpop.f32.mrf.mxu1  ;;  %v1314_v8 = vadd.f32 %v1313_v33, %v254_v4 }
 0x11f   :  { %v1315_v44 = vpop.f32.mrf.mxu0 }
 0x120   :  { %v1356_v45 = vpop.f32.mrf.mxu1  ;;  %v1316_v9 = vadd.f32 %v1315_v44, %v258_v5  ;;  %v1355_v10 = vadd.f32 %v1354_v43, %v1314_v8 }
 0x121   :  { %v1317_v48 = vpop.f32.mrf.mxu0 }
 0x122   :  { %v1358_v49 = vpop.f32.mrf.mxu1  ;;  %v1357_v12 = vadd.f32 %v1356_v45, %v1316_v9 }
 0x123   :  { %v1318_v50 = vpop.f32.mrf.mxu0 }
 0x124   :  { %v1359_v52 = vpop.f32.mrf.mxu1 }
 0x126   :  { %v1436_v55 = vpop.f32.mrf.mxu1 }
 0x128   :  { %v1438_v56 = vpop.f32.mrf.mxu1 }
 0x12a   :  { %v1440_v59 = vpop.f32.mrf.mxu1 }
 0x12b   :  { %v2170_v59 = vld [vmem:[%s2737_s4] ss:$0 sm:$0xff] }
 0x12c   :  { %v1441_v60 = vpop.f32.mrf.mxu1 }
 0x15d   :  { %v1395_v11 = vpop.f32.mrf.mxu0 }
 0x15e   :  { %v1396_v15 = vadd.f32 %v1395_v11, %v1355_v10 }
 0x15f   :  { %v1397_v16 = vpop.f32.mrf.mxu0 }
 0x160   :  { %v1437_v18 = vadd.f32 %v1436_v55, %v1396_v15  ;;  %v1398_v19 = vadd.f32 %v1397_v16, %v1357_v12 }
 0x161   :  { %v1399_v20 = vpop.f32.mrf.mxu0 }
 0x162   :  { %v1439_v21 = vadd.f32 %v1438_v56, %v1398_v19  ;;  %v1607_v22 = vmax.f32 %v1437_v18, 0.0 }
 0x163   :  { %v1400_v23 = vpop.f32.mrf.mxu0 }
 0x164   :  { %v1608_v24 = vmax.f32 %v1439_v21, 0.0  ;;  %v1611_v27 = vpack.c.bf16 %v1607_v22, %v1607_v22 }
 0x166   :  { %v1477_v25 = vpop.f32.mrf.mxu1  ;;  %v1612_v26 = vpack.c.bf16 %v1608_v24, %v1608_v24 }
 0x167   :  { %v1478_v51 = vadd.f32 %v1477_v25, %v262_v32 }
 0x168   :  { %v1479_v28 = vpop.f32.mrf.mxu1  ;;  %1910 = vmatprep.mubr.bf16.mxu0 %v1612_v26 }
 0x169   :  { %1911 = vmatmul.mubr.bf16.vlgmr.msra.gmra.mxu0 %v1611_v27  ;;  %v1480_v36 = vadd.f32 %v1479_v28, %v266_v14 }
 0x16a   :  { %v1481_v7 = vpop.f32.mrf.mxu1 }
 0x16c   :  { %v1482_v29 = vpop.f32.mrf.mxu1 }
 0x19d   :  { %v1518_v13 = vpop.f32.mrf.mxu0 }
 0x19e   :  { %v1519_v37 = vadd.f32 %v1518_v13, %v1478_v51 }
 0x19f   :  { %v1520_v34 = vpop.f32.mrf.mxu0 }
 0x1a0   :  { %v1521_v39 = vadd.f32 %v1520_v34, %v1480_v36 }
 0x1a1   :  { %v1522_v17 = vpop.f32.mrf.mxu0 }
 0x1a3   :  { %v1523_v35 = vpop.f32.mrf.mxu0 }
 0x1a5   :  { %v1600_v6 = vpop.f32.mrf.mxu0 }
 0x1a6   :  { %v1559_v38 = vpop.f32.mrf.mxu1 }
 0x1a7   :  { %v1560_v40 = vadd.f32 %v1559_v38, %v1519_v37  ;;  %v1602_v42 = vpop.f32.mrf.mxu0 }
 0x1a8   :  { %v1561_v41 = vpop.f32.mrf.mxu1 }
 0x1a9   :  { %v1601_v33 = vadd.f32 %v1600_v6, %v1560_v40  ;;  %v1562_v43 = vadd.f32 %v1561_v41, %v1521_v39  ;;  %v1604_v45 = vpop.f32.mrf.mxu0 }
 0x1aa   :  { %v1563_v44 = vpop.f32.mrf.mxu1 }
 0x1ab   :  { %v1603_v46 = vadd.f32 %v1602_v42, %v1562_v43  ;;  %v1609_v47 = vmax.f32 %v1601_v33, 0.0  ;;  %v1605_v49 = vpop.f32.mrf.mxu0 }
 0x1ac   :  { %v1564_v48 = vpop.f32.mrf.mxu1 }
 0x1ad   :  { %v1610_v50 = vmax.f32 %v1603_v46, 0.0  ;;  %v1613_v53 = vpack.c.bf16 %v1609_v47, %v1609_v47 }
 0x1af   :  { %v1614_v52 = vpack.c.bf16 %v1610_v50, %v1610_v50 }
 0x1b1   :  { %1950 = vmatprep.mubr.bf16.mxu1 %v1614_v52 }
 0x1b2   :  { %1951 = vmatmul.mubr.bf16.vlgmr.msra.gmra.mxu1 %v1613_v53 }
 0x229   :  { %v2219_v54 = vpop.f32.mrf.mxu0 }
 0x22b   :  { %v2220_v55 = vpop.f32.mrf.mxu0 }
 0x22c   :  { %v2221_v56 = vadd.f32 %v2220_v55, %v2219_v54 }
 0x22d   :  { %v2222_v57 = vpop.f32.mrf.mxu0 }
 0x22e   :  { %v1913_v62 = vadd.f32 %v2221_v56, %v2170_v59 }
 0x22f   :  { %v2223_v58 = vpop.f32.mrf.mxu0 }
 0x272   :  { %v2241_v60 = vpop.f32.mrf.mxu1 }
 0x274   :  { %v2242_v61 = vpop.f32.mrf.mxu1 }
 0x275   :  { %v2243_v63 = vadd.f32 %v2242_v61, %v2241_v60 }
 0x276   :  { %v2244_v0 = vpop.f32.mrf.mxu1 }
 0x277   :  { %v1953_v1 = vadd.f32 %v2243_v63, %v1913_v62 }
 0x278   :  { %v2245_v2 = vpop.f32.mrf.mxu1 }
 0x279   :  { %1958 = vst [vmem:[%s2738_s5] sm:$0xff] %v1953_v1 }
 0x27a   :  { %1963 = vsyncpa [#allocation3], 1 }
 0x27b   :  { %1964 = vsyncpa [#allocation5], 1 }

</bundles_post_ra>
